<compile_context>
chip_gen: v6e
topology: v6e:2x2x1
jax: 0.10.0
libtpu: 0.0.40
codegen_flags: <defaults>
</compile_context>

<pallas_src>
import functools
import math

import jax
import jax.numpy as jnp
from jax.experimental import pallas as pl
from jax.experimental.pallas import tpu as pltpu


def _cheb_gc_kernel(a_ref, a2_ref, p_ref, brow_ref, x_ref, o_ref, *, Ks):
    """One block of BB batch entries (N = BB*T lane-packed rows), fully fused.

    a_ref:    (Lin, Lin)        kron(gso^T, I_c_in)
    a2_ref:   (Lin, Lin)        2 * kron(gso^T, I_c_in)       (2x pre-folded)
    p_ref:    (Ks*Lin, Lout)    stacked projections, channel-major output lanes;
                                k=0 slab has residual + align folded in
    brow_ref: (1, Lout)         bias repeated per vertex (channel-major)
    x_ref:    (BB, T, Lin)      lane-packed input block  (lane = v*c_in + c)
    o_ref:    (BB, T, Lout)     lane-packed output block (lane = j*V + v)
    """
    BB, T, Lin = x_ref.shape
    Lout = o_ref.shape[-1]
    N = BB * T

    # Free reshape: collapse (BB, T) rows; lanes unchanged.
    x0 = x_ref[...].reshape(N, Lin)

    # --- Chebyshev recursion on the lane-packed layout ---
    xs = [x0]
    if Ks >= 2:
        x1 = jnp.dot(x0, a_ref[...], preferred_element_type=jnp.float32)
        xs.append(x1)
        xm2, xm1 = x0, x1
        for _ in range(2, Ks):
            xk = jnp.dot(xm1, a2_ref[...], preferred_element_type=jnp.float32) - xm2
            xs.append(xk)
            xm2, xm1 = xm1, xk

    # --- One deep, fused projection matmul: (N, Ks*Lin) @ (Ks*Lin, Lout) ---
    xcat = xs[0] if Ks == 1 else jnp.concatenate(xs, axis=-1)
    acc = jnp.dot(xcat, p_ref[...], preferred_element_type=jnp.float32)
    acc = acc + brow_ref[...]                       # bias, broadcast over rows

    # Lane-dense (Lout = c_out*V) unmasked store.
    o_ref[...] = acc.reshape(BB, T, Lout).astype(o_ref.dtype)


def _pick_block_batch(B, T, bytes_per_batch, budget_bytes=12 << 20, min_rows=256):
    """Choose the batch block size BB (a divisor of B).

    * Largest divisor whose (double-buffered) block fits `budget_bytes`.
    * Among the fitting divisors, prefer the smallest one that still gives
      N = BB*T >= min_rows rows (fills MXU rows and amortizes the ~0.35 us
      per-step overhead) so larger batches keep >1 grid step for v7x's two
      TensorCores; otherwise take the largest fitting divisor (no forced
      2-step grid — v5e/v6e are single-TC).
    """
    divisors = [d for d in range(1, B + 1) if B % d == 0]
    fitting = [d for d in divisors if d * bytes_per_batch <= budget_bytes]
    if not fitting:
        return 1
    wide = [d for d in fitting if d * T >= min_rows]
    return min(wide) if wide else max(fitting)


def graph_conv_layer_forward(x_nchw, gso, weight, bias, *, c_out, Ks):
    """GraphConvLayer.forward for graph_conv_type='cheb_graph_conv'.

    x_nchw: (B, c_in, T, V) float32
    gso:    (V, V)
    weight: (Ks, c_out, c_out)
    bias:   (c_out,)
    returns (B, c_out, T, V) float32
    """
    B, c_in, T, V = x_nchw.shape
    if c_in > c_out:
        # TODO(synk): 1x1 align-conv branch (c_in > c_out) not exercised in this config.
        raise NotImplementedError("align conv (c_in > c_out) not implemented")

    f32 = jnp.float32
    Lin, Lout = V * c_in, V * c_out

    # Chebyshev shift on the lane-packed layout; the 2x of the recursion is
    # pre-folded into A2 (no per-element VPU multiply in the kernel).
    a_mat = jnp.kron(gso.T.astype(f32), jnp.eye(c_in, dtype=f32))      # (Lin, Lin)
    a2_mat = 2.0 * a_mat

    # Projection matrices with CHANNEL-MAJOR output lanes (lane = j*V + v).
    # Channels c_in..c_out of the aligned input are identically zero through
    # the whole recursion, so only the first c_in rows of each W_k matter; the
    # "+ x_gc_in" residual is an identity on those channels and is folded into
    # the k = 0 projection (no pad/concat HBM pass).
    w_eff = weight[:, :c_in, :].astype(f32)                            # (Ks, c_in, c_out)
    w_eff = w_eff.at[0].add(jnp.eye(c_in, c_out, dtype=f32))
    eye_v = jnp.eye(V, dtype=f32)
    # P[k, v*c_in + c, j*V + w] = I_V[v, w] * W_k[c, j]
    p_mat = jnp.einsum('vw,kcj->kvcjw', eye_v, w_eff).reshape(Ks * Lin, Lout)

    # Bias in the same channel-major lane order.
    brow = jnp.repeat(bias.astype(f32), V).reshape(1, Lout)            # (1, Lout)

    # Lane-packed input view (one tiny XLA transpose; lane = v*c_in + c).
    x_packed = jnp.transpose(x_nchw.astype(f32), (0, 2, 3, 1)).reshape(B, T, Lin)

    # Per-batch-entry VMEM footprint (lane dims pad to 128): double-buffered
    # in+out blocks plus the fused (N, Ks*Lin) concat temporary.
    lane_pad = lambda n: -(-n // 128) * 128
    bytes_per_batch = 4 * T * (2 * (lane_pad(Lin) + lane_pad(Lout)) + lane_pad(Ks * Lin))
    BB = _pick_block_batch(B, T, bytes_per_batch)
    grid = (B // BB,)

    kernel = functools.partial(_cheb_gc_kernel, Ks=Ks)

    out_packed = pl.pallas_call(
        kernel,
        out_shape=jax.ShapeDtypeStruct((B, T, Lout), f32),
        grid_spec=pltpu.PrefetchScalarGridSpec(
            num_scalar_prefetch=0,
            grid=grid,
            in_specs=[
                pl.BlockSpec((Lin, Lin), lambda i: (0, 0)),            # A   (resident)
                pl.BlockSpec((Lin, Lin), lambda i: (0, 0)),            # 2A  (resident)
                pl.BlockSpec((Ks * Lin, Lout), lambda i: (0, 0)),      # P   (resident)
                pl.BlockSpec((1, Lout), lambda i: (0, 0)),             # bias row
                pl.BlockSpec((BB, T, Lin), lambda i: (i, 0, 0)),       # x block (lane-packed)
            ],
            out_specs=pl.BlockSpec((BB, T, Lout), lambda i: (i, 0, 0)),
        ),
        compiler_params=pltpu.CompilerParams(
            dimension_semantics=("parallel",),
            vmem_limit_bytes=32 * 1024 * 1024,   # block budget (12 MiB, 2x-buffered) + constants << 32 MiB; fits v7x's 64 MiB
        ),
    )(a_mat, a2_mat, p_mat, brow, x_packed)

    # Channel-major lanes -> NCHW: one small XLA transpose on the output.
    return jnp.transpose(out_packed.reshape(B, T, c_out, V), (0, 2, 1, 3))


def _reference_forward(x_nchw, gso, weight, bias, *, c_out, Ks):
    """Pure-JAX reference mirroring the PyTorch module (pad + einsums)."""
    B, c_in, T, V = x_nchw.shape
    if c_in < c_out:
        pad = jnp.zeros((B, c_out - c_in, T, V), dtype=x_nchw.dtype)
        x_gc_in = jnp.concatenate([x_nchw, pad], axis=1)
    else:
        x_gc_in = x_nchw
    x = jnp.transpose(x_gc_in, (0, 2, 3, 1))                           # (B, T, V, C)
    x_list = [x]
    if Ks >= 2:
        x_list.append(jnp.einsum('hi,btij->bthj', gso, x))
    for k in range(2, Ks):
        x_list.append(jnp.einsum('hi,btij->bthj', 2.0 * gso, x_list[k - 1]) - x_list[k - 2])
    xs = jnp.stack(x_list, axis=2)                                     # (B, T, Ks, V, C)
    gc = jnp.einsum('btkhi,kij->bthj', xs, weight) + bias
    gc = jnp.transpose(gc, (0, 3, 1, 2))                               # (B, C, T, V)
    return gc + x_gc_in


if __name__ == "__main__":
    B, c_in, c_out, T, V, Ks = 2, 4, 8, 8, 16, 3

    key = jax.random.PRNGKey(0)
    k_x, k_w, k_b, k_g = jax.random.split(key, 4)

    # Deterministic parameter init (mimics kaiming_uniform_/uniform_ bounds).
    fan_in = c_out
    w_bound = math.sqrt(6.0 / ((1.0 + 5.0) * fan_in))                  # kaiming_uniform, a=sqrt(5)
    weight = jax.random.uniform(k_w, (Ks, c_out, c_out), jnp.float32,
                                minval=-w_bound, maxval=w_bound)
    b_bound = 1.0 / math.sqrt(fan_in)
    bias = jax.random.uniform(k_b, (c_out,), jnp.float32,
                              minval=-b_bound, maxval=b_bound)

    # Deterministic symmetric-normalized graph shift operator.
    a = jax.random.uniform(k_g, (V, V), jnp.float32)
    adj = ((a + a.T) * 0.5 > 0.5).astype(jnp.float32) + jnp.eye(V, dtype=jnp.float32)
    deg = jnp.sum(adj, axis=1)
    d_inv_sqrt = 1.0 / jnp.sqrt(deg)
    gso = adj * d_inv_sqrt[:, None] * d_inv_sqrt[None, :]

    x = jax.random.normal(k_x, (B, c_in, T, V), jnp.float32)

    out = graph_conv_layer_forward(x, gso, weight, bias, c_out=c_out, Ks=Ks)
    out = jax.block_until_ready(out)

    ref = _reference_forward(x, gso, weight, bias, c_out=c_out, Ks=Ks)
    assert out.shape == (B, c_out, T, V)
    assert jnp.allclose(out, ref, atol=5e-4, rtol=5e-4), "mismatch vs reference"

    print("KERNEL_OK")
</pallas_src>

<mosaic_0001>
module attributes {stable_mosaic.version = 11 : i64} {
  func.func @_cheb_gc_kernel(%arg0: i32, %arg1: memref<64x64xf32, #tpu.memory_space<vmem>>, %arg2: memref<64x64xf32, #tpu.memory_space<vmem>>, %arg3: memref<192x128xf32, #tpu.memory_space<vmem>>, %arg4: memref<1x128xf32, #tpu.memory_space<vmem>>, %arg5: memref<2x8x64xf32, #tpu.memory_space<vmem>>, %arg6: memref<2x8x128xf32, #tpu.memory_space<vmem>>) attributes {dimension_semantics = [#tpu.dimension_semantics<parallel>], iteration_bounds = array<i64: 1>, scalar_prefetch = 0 : i64, scratch_operands = 0 : i64, tpu.core_type = #tpu.core_type<tc>, window_params = [{pipeline_mode = #tpu.pipeline_mode<synchronous>, transform_indices = @transform_0, window_bounds = array<i64: 64, 64>}, {pipeline_mode = #tpu.pipeline_mode<synchronous>, transform_indices = @transform_1, window_bounds = array<i64: 64, 64>}, {pipeline_mode = #tpu.pipeline_mode<synchronous>, transform_indices = @transform_2, window_bounds = array<i64: 192, 128>}, {pipeline_mode = #tpu.pipeline_mode<synchronous>, transform_indices = @transform_3, window_bounds = array<i64: 1, 128>}, {transform_indices = @transform_4, window_bounds = array<i64: 2, 8, 64>}, {transform_indices = @transform_5, window_bounds = array<i64: 2, 8, 128>}]} {
    %c0 = arith.constant 0 : index
    %c0_0 = arith.constant 0 : index
    %c0_1 = arith.constant 0 : index
    %0 = vector.load %arg5[%c0, %c0_0, %c0_1] : memref<2x8x64xf32, #tpu.memory_space<vmem>>, vector<2x8x64xf32>
    %1 = vector.shape_cast %0 : vector<2x8x64xf32> to vector<16x64xf32>
    %c0_2 = arith.constant 0 : index
    %c0_3 = arith.constant 0 : index
    %2 = vector.load %arg1[%c0_2, %c0_3] : memref<64x64xf32, #tpu.memory_space<vmem>>, vector<64x64xf32>
    %cst = arith.constant dense<0.000000e+00> : vector<16x64xf32>
    %3 = tpu.matmul %1, %2, %cst {dimension_numbers = #tpu.dot_dimension_numbers<[1], [0], [0], [1], [0, 0, 1, 1], [], []>} : vector<16x64xf32>, vector<64x64xf32>, vector<16x64xf32> -> vector<16x64xf32>
    %c0_4 = arith.constant 0 : index
    %c0_5 = arith.constant 0 : index
    %4 = vector.load %arg2[%c0_4, %c0_5] : memref<64x64xf32, #tpu.memory_space<vmem>>, vector<64x64xf32>
    %cst_6 = arith.constant dense<0.000000e+00> : vector<16x64xf32>
    %5 = tpu.matmul %3, %4, %cst_6 {dimension_numbers = #tpu.dot_dimension_numbers<[1], [0], [0], [1], [0, 0, 1, 1], [], []>} : vector<16x64xf32>, vector<64x64xf32>, vector<16x64xf32> -> vector<16x64xf32>
    %6 = arith.subf %5, %1 : vector<16x64xf32>
    %7 = tpu.concatenate %1, %3, %6 in 1 : vector<16x64xf32>, vector<16x64xf32>, vector<16x64xf32> -> vector<16x192xf32>
    %c0_7 = arith.constant 0 : index
    %c0_8 = arith.constant 0 : index
    %8 = vector.load %arg3[%c0_7, %c0_8] : memref<192x128xf32, #tpu.memory_space<vmem>>, vector<192x128xf32>
    %cst_9 = arith.constant dense<0.000000e+00> : vector<16x128xf32>
    %9 = tpu.matmul %7, %8, %cst_9 {dimension_numbers = #tpu.dot_dimension_numbers<[1], [0], [0], [1], [0, 0, 1, 1], [], []>} : vector<16x192xf32>, vector<192x128xf32>, vector<16x128xf32> -> vector<16x128xf32>
    %c0_10 = arith.constant 0 : index
    %c0_11 = arith.constant 0 : index
    %10 = vector.load %arg4[%c0_10, %c0_11] : memref<1x128xf32, #tpu.memory_space<vmem>>, vector<1x128xf32>
    %11 = vector.broadcast %10 : vector<1x128xf32> to vector<16x128xf32>
    %12 = arith.addf %9, %11 : vector<16x128xf32>
    %13 = vector.shape_cast %12 : vector<16x128xf32> to vector<2x8x128xf32>
    %c0_12 = arith.constant 0 : index
    %c0_13 = arith.constant 0 : index
    %c0_14 = arith.constant 0 : index
    %14 = vector.load %arg6[%c0_12, %c0_13, %c0_14] : memref<2x8x128xf32, #tpu.memory_space<vmem>>, vector<2x8x128xf32>
    tpu.vector_store %arg6[%c0_12, %c0_13, %c0_14], %13 {strides = array<i32>} : memref<2x8x128xf32, #tpu.memory_space<vmem>>, vector<2x8x128xf32>,
    return
  }
  func.func @transform_0(%arg0: i32) -> (i32, i32) {
    %c0_i32 = arith.constant 0 : i32
    %c0_i32_0 = arith.constant 0 : i32
    %c0_i32_1 = arith.constant 0 : i32
    return %c0_i32, %c0_i32_0 : i32, i32
  }
  func.func @transform_1(%arg0: i32) -> (i32, i32) {
    %c0_i32 = arith.constant 0 : i32
    %c0_i32_0 = arith.constant 0 : i32
    %c0_i32_1 = arith.constant 0 : i32
    return %c0_i32, %c0_i32_0 : i32, i32
  }
  func.func @transform_2(%arg0: i32) -> (i32, i32) {
    %c0_i32 = arith.constant 0 : i32
    %c0_i32_0 = arith.constant 0 : i32
    %c0_i32_1 = arith.constant 0 : i32
    return %c0_i32, %c0_i32_0 : i32, i32
  }
  func.func @transform_3(%arg0: i32) -> (i32, i32) {
    %c0_i32 = arith.constant 0 : i32
    %c0_i32_0 = arith.constant 0 : i32
    %c0_i32_1 = arith.constant 0 : i32
    return %c0_i32, %c0_i32_0 : i32, i32
  }
  func.func @transform_4(%arg0: i32) -> (i32, i32, i32) {
    %c0_i32 = arith.constant 0 : i32
    %c0_i32_0 = arith.constant 0 : i32
    %c0_i32_1 = arith.constant 0 : i32
    return %arg0, %c0_i32, %c0_i32_0 : i32, i32, i32
  }
  func.func @transform_5(%arg0: i32) -> (i32, i32, i32) {
    %c0_i32 = arith.constant 0 : i32
    %c0_i32_0 = arith.constant 0 : i32
    %c0_i32_1 = arith.constant 0 : i32
    return %arg0, %c0_i32, %c0_i32_0 : i32, i32, i32
  }
}

</mosaic_0001>

<bundles_post_ra>
// kernel: tpu_custom_call.1
= control target key start
LH: loop header
LB: loop body
LE: loop exit
PB: predicated region body
PF: predicated region fallthrough
CT: control target
= control target key end

     0   :  { %10 = vsyncpa [#allocation3], 0  ;;  %s696_s0 = inlined_call_operand.hbm [shape: f32[64,64], index: 0, kind: input, shape index: {}]   ;;  %s697_s1 = inlined_call_operand.hbm [shape: f32[64,64], index: 1, kind: input, shape index: {}]   ;;  %s698_s2 = inlined_call_operand.hbm [shape: f32[192,128], index: 2, kind: input, shape index: {}]   ;;  %s699_s3 = inlined_call_operand.vmem [shape: f32[1,128], index: 3, kind: input, shape index: {}]   ;;  %s700_s4 = inlined_call_operand.hbm [shape: f32[2,8,64], index: 4, kind: input, shape index: {}]   ;;  %s701_s5 = inlined_call_operand.hbm [shape: f32[2,8,128], index: 5, kind: output, shape index: {}]  }
   0x1   :  { %11 = vsyncpa [#allocation6], 0 }
   0x2   :  { %12 = vsyncpa [#allocation9], 0 }
   0x3   :  { %13 = vsyncpa [#allocation4], 0  ;;  %s582_s18 = smov [#allocation5]   ;;  %s583_s20 = smov [#allocation2]  }
   0x4   :  { %s31_s19 = sshll.u32 %s582_s18, 4  ;;  %s19_s21 = sshll.u32 %s583_s20, 4  ;;  %s32_s19 = int_to_ptr.vmem [resolvable:$true] %s31_s19  ;;  %s20_s21 = int_to_ptr.vmem [resolvable:$true] %s19_s21 }
   0x5   :  { %s482_s22 = scalar_lea.vmem %s32_s19, 1024  ;;  %p487_p1 = scmp.lt.s32.totalorder %s32_s19, %s32_s19 }
   0x6   :  { %p483_p0 = scmp.ne.s32.totalorder %s32_s19, %s482_s22  ;;  %p488_p2 = scmp.lt.s32.totalorder %s482_s22, %s482_s22 }
   0x8   :  { %p489_p3 = por %p488_p2, %p487_p1 }
   0xa   :  { %p490_p4 = pnand %p489_p3, %p483_p0 }
   0xc   :  { %493 = shalt.err (!%p490_p4)
}
   0xd   :  { %s584_s23 = smov 128   ;;  %s585_s24 = smov 8  }
   0xe   :  { %37 = dma.hbm_to_vmem [thread:$0]  %s697_s1, 1024, %s32_s19, [#allocation6], %s584_s23, %s584_s23, %s585_s24  }
   0xf   :  { %s502_s27 = scalar_lea.vmem %s20_s21, 1024  ;;  %p507_p6 = scmp.lt.s32.totalorder %s20_s21, %s20_s21 }
  0x10   :  { %p503_p5 = scmp.ne.s32.totalorder %s20_s21, %s502_s27  ;;  %p508_p7 = scmp.lt.s32.totalorder %s502_s27, %s502_s27 }
  0x12   :  { %p509_p8 = por %p508_p7, %p507_p6 }
  0x14   :  { %p510_p9 = pnand %p509_p8, %p503_p5 }
  0x16   :  { %513 = shalt.err (!%p510_p9)
}
  0x17   :  { %25 = dma.hbm_to_vmem [thread:$0]  %s696_s0, 1024, %s20_s21, [#allocation3], %s584_s23, %s584_s23, %s585_s24  }
  0x18   :  { %s586_s30 = smov [#allocation7]   ;;  %s587_s7 = smov [#allocation8]  }
  0x19   :  { %s43_s6 = sshll.u32 %s586_s30, 4  ;;  %s57_s8 = sshll.u32 %s587_s7, 4  ;;  %s44_s6 = int_to_ptr.vmem [resolvable:$true] %s43_s6  ;;  %s58_s8 = int_to_ptr.vmem [resolvable:$true] %s57_s8 }
  0x1a   :  { %s522_s1 = scalar_lea.vmem %s44_s6, 3072  ;;  %p527_p11 = scmp.lt.s32.totalorder %s44_s6, %s44_s6 }
  0x1b   :  { %p523_p10 = scmp.ne.s32.totalorder %s44_s6, %s522_s1  ;;  %p528_p12 = scmp.lt.s32.totalorder %s522_s1, %s522_s1 }
  0x1d   :  { %p529_p13 = por %p528_p12, %p527_p11 }
  0x1f   :  { %p530_p0 = pnand %p529_p13, %p523_p10 }
  0x21   :  { %533 = shalt.err (!%p530_p0)
}
  0x22   :  { %49 = dma.hbm_to_vmem [thread:$0]  %s698_s2, 3072, %s44_s6, [#allocation6], %s584_s23, %s584_s23, %s585_s24  }
  0x23   :  { %s542_s0 = scalar_lea.vmem %s58_s8, 256  ;;  %p547_p2 = scmp.lt.s32.totalorder %s58_s8, %s58_s8 }
  0x24   :  { %p543_p1 = scmp.ne.s32.totalorder %s58_s8, %s542_s0  ;;  %p548_p3 = scmp.lt.s32.totalorder %s542_s0, %s542_s0 }
  0x26   :  { %p549_p4 = por %p548_p3, %p547_p2 }
  0x28   :  { %p550_p5 = pnand %p549_p4, %p543_p1 }
  0x2a   :  { %553 = shalt.err (!%p550_p5)
}
  0x2b   :  { %63 = dma.hbm_to_vmem [thread:$0]  %s700_s4, 256, %s58_s8, [#allocation9], %s584_s23, %s584_s23, %s585_s24  }
  0x2c   :  { %574 = dma.done.wait [#allocation3], 1024  }
  0x2d   :  { %575 = vsyncadd [#allocation3], 4294966272 }
  0x2e   :  { %576 = dma.done.wait [#allocation6], 4096  }
  0x2f   :  { %577 = vsyncadd [#allocation6], 4294963200 }
  0x30   :  { %578 = dma.done.wait [#allocation9], 256  }
  0x31   :  { %579 = vsyncadd [#allocation9], 4294967040  ;;  %v85_v0 = vld [vmem:[#allocation2 + $0x38] sm:$0xff]  ;;  %v84_v1 = vld [vmem:[#allocation2 + $0x30] sm:$0xff]  ;;  %vm86_vm0 = vcmask 523264   ;;  %v588_v19 = vmov 0.0  }
  0x32   :  { %427 = vmatprep.subr.mxu1 %v85_v0  ;;  %v83_v2 = vld [vmem:[#allocation2 + $0x28] sm:$0xff]  ;;  %v645_v3 = vld [vmem:[#allocation8] sm:$0xff]  ;;  %v81_v5 = vld [vmem:[#allocation2 + $0x18] sm:$0xff]  ;;  %304 = vmatprep.subr.mxu0 %v588_v19  ;;  %s589_s2 = smov 64   ;;  %s590_s14 = smov [#allocation10]  }
  0x33   :  { %428 = vmatpush3.msra.mxu1 %v85_v0  ;;  %443 = vmatprep.mubr.msk.f32.mxu1 %vm86_vm0, %v645_v3  ;;  %v82_v4 = vld [vmem:[#allocation2 + $0x20] sm:$0xff]  ;;  %v80_v6 = vld [vmem:[#allocation2 + $0x10] sm:$0xff]  ;;  %v79_v7 = vld [vmem:[#allocation2 + $0x8] sm:$0xff]  ;;  %s386_s15 = sshll.u32 %s590_s14, 4  ;;  %s387_s15 = int_to_ptr.vmem [resolvable:$true] %s386_s15 }
  0x34   :  { %429 = vmatprep.subr.mxu1 %v84_v1  ;;  %v78_v8 = vld [vmem:[#allocation2] sm:$0xff]  ;;  %v649_v9 = vld [vmem:[#allocation8 + $0x8] sm:$0xff]  ;;  %v175_v10 = vld [vmem:[#allocation5 + $0x38] sm:$0xff]  ;;  %s554_s16 = scalar_lea.vmem %s387_s15, 256  ;;  %p559_p7 = scmp.lt.s32.totalorder %s387_s15, %s387_s15 }
  0x35   :  { %430 = vmatpush3.msra.mxu1 %v84_v1  ;;  %v174_v11 = vld [vmem:[#allocation5 + $0x30] sm:$0xff]  ;;  %v173_v12 = vld [vmem:[#allocation5 + $0x28] sm:$0xff]  ;;  %v172_v13 = vld [vmem:[#allocation5 + $0x20] sm:$0xff]  ;;  %p555_p6 = scmp.ne.s32.totalorder %s387_s15, %s554_s16  ;;  %p560_p8 = scmp.lt.s32.totalorder %s554_s16, %s554_s16 }
  0x36   :  { %431 = vmatprep.subr.mxu1 %v83_v2  ;;  %v171_v14 = vld [vmem:[#allocation5 + $0x18] sm:$0xff]  ;;  %v170_v15 = vld [vmem:[#allocation5 + $0x10] sm:$0xff]  ;;  %v169_v16 = vld [vmem:[#allocation5 + $0x8] sm:$0xff] }
  0x37   :  { %432 = vmatpush3.msra.mxu1 %v83_v2  ;;  %v168_v17 = vld [vmem:[#allocation5] sm:$0xff]  ;;  %v282_v18 = vld [vmem:[#allocation7 + $0x78] sm:$0xff]  ;;  %v281_v20 = vld [vmem:[#allocation7 + $0x70] sm:$0xff]  ;;  %p561_p9 = por %p560_p8, %p559_p7 }
  0x38   :  { %433 = vmatprep.subr.mxu1 %v82_v4  ;;  %305 = vmatpush1.msra.mxu0 %v282_v18  ;;  %v280_v21 = vld [vmem:[#allocation7 + $0x68] sm:$0xff]  ;;  %v279_v22 = vld [vmem:[#allocation7 + $0x60] sm:$0xff]  ;;  %v278_v24 = vld [vmem:[#allocation7 + $0x58] sm:$0xff] }
  0x39   :  { %434 = vmatpush3.msra.mxu1 %v82_v4  ;;  %306 = vmatprep.subr.mxu0 %v588_v19  ;;  %v277_v26 = vld [vmem:[#allocation7 + $0x50] sm:$0xff]  ;;  %v276_v27 = vld [vmem:[#allocation7 + $0x48] sm:$0xff]  ;;  %v275_v28 = vld [vmem:[#allocation7 + $0x40] sm:$0xff]  ;;  %p562_p10 = pnand %p561_p9, %p555_p6 }
  0x3a   :  { %435 = vmatprep.subr.mxu1 %v81_v5  ;;  %307 = vmatpush1.msra.mxu0 %v281_v20  ;;  %v274_v29 = vld [vmem:[#allocation7 + $0x38] sm:$0xff]  ;;  %v273_v30 = vld [vmem:[#allocation7 + $0x30] sm:$0xff]  ;;  %v272_v31 = vld [vmem:[#allocation7 + $0x28] sm:$0xff] }
  0x3b   :  { %436 = vmatpush3.msra.mxu1 %v81_v5  ;;  %308 = vmatprep.subr.mxu0 %v588_v19  ;;  %v271_v32 = vld [vmem:[#allocation7 + $0x20] sm:$0xff]  ;;  %v270_v33 = vld [vmem:[#allocation7 + $0x18] sm:$0xff]  ;;  %v269_v34 = vld [vmem:[#allocation7 + $0x10] sm:$0xff] }
  0x3c   :  { %437 = vmatprep.subr.mxu1 %v80_v6  ;;  %309 = vmatpush1.msra.mxu0 %v280_v21  ;;  %v268_v35 = vld [vmem:[#allocation7 + $0x8] sm:$0xff]  ;;  %v267_v36 = vld [vmem:[#allocation7] sm:$0xff]  ;;  %v290_v37 = vld [vmem:[#allocation7 + $0xb8] sm:$0xff] }
  0x3d   :  { %438 = vmatpush3.msra.mxu1 %v80_v6  ;;  %310 = vmatprep.subr.mxu0 %v588_v19  ;;  %v289_v38 = vld [vmem:[#allocation7 + $0xb0] sm:$0xff]  ;;  %v288_v39 = vld [vmem:[#allocation7 + $0xa8] sm:$0xff]  ;;  %v287_v40 = vld [vmem:[#allocation7 + $0xa0] sm:$0xff] }
  0x3e   :  { %439 = vmatprep.subr.mxu1 %v79_v7  ;;  %311 = vmatpush1.msra.mxu0 %v279_v22  ;;  %v286_v41 = vld [vmem:[#allocation7 + $0x98] sm:$0xff]  ;;  %v285_v42 = vld [vmem:[#allocation7 + $0x90] sm:$0xff]  ;;  %v284_v43 = vld [vmem:[#allocation7 + $0x88] sm:$0xff] }
  0x3f   :  { %440 = vmatpush3.msra.mxu1 %v79_v7  ;;  %312 = vmatprep.subr.mxu0 %v588_v19  ;;  %v283_v44 = vld [vmem:[#allocation7 + $0x80] sm:$0xff] }
  0x40   :  { %441 = vmatprep.subr.mxu1 %v78_v8  ;;  %313 = vmatpush1.msra.mxu0 %v278_v24  ;;  %v404_v53 = vld [vmem:[%s699_s3] ss:$0 sm:$0xff] }
  0x41   :  { %442 = vmatpush3.msra.mxu1 %v78_v8  ;;  %314 = vmatprep.subr.mxu0 %v588_v19 }
  0x42   :  { %444 = vmatmul.mubr.msk.f32.vlgmr.msra.gmra.mxu1 %vm86_vm0, %v649_v9  ;;  %446 = vmatprep.subr.mxu1 %v175_v10 }
  0x43   :  { %447 = vmatpush3.msra.mxu1 %v175_v10  ;;  %315 = vmatpush1.msra.mxu0 %v277_v26 }
  0x44   :  { %448 = vmatprep.subr.mxu1 %v174_v11  ;;  %316 = vmatprep.subr.mxu0 %v588_v19 }
  0x45   :  { %449 = vmatpush3.msra.mxu1 %v174_v11  ;;  %317 = vmatpush1.msra.mxu0 %v276_v27 }
  0x46   :  { %450 = vmatprep.subr.mxu1 %v173_v12  ;;  %318 = vmatprep.subr.mxu0 %v588_v19 }
  0x47   :  { %451 = vmatpush3.msra.mxu1 %v173_v12  ;;  %319 = vmatpush1.msra.mxu0 %v275_v28 }
  0x48   :  { %452 = vmatprep.subr.mxu1 %v172_v13  ;;  %320 = vmatprep.subr.mxu0 %v588_v19 }
  0x49   :  { %453 = vmatpush3.msra.mxu1 %v172_v13  ;;  %321 = vmatpush1.msra.mxu0 %v274_v29 }
  0x4a   :  { %454 = vmatprep.subr.mxu1 %v171_v14  ;;  %322 = vmatprep.subr.mxu0 %v588_v19 }
  0x4b   :  { %455 = vmatpush3.msra.mxu1 %v171_v14  ;;  %323 = vmatpush1.msra.mxu0 %v273_v30 }
  0x4c   :  { %456 = vmatprep.subr.mxu1 %v170_v15  ;;  %324 = vmatprep.subr.mxu0 %v588_v19 }
  0x4d   :  { %457 = vmatpush3.msra.mxu1 %v170_v15  ;;  %325 = vmatpush1.msra.mxu0 %v272_v31 }
  0x4e   :  { %458 = vmatprep.subr.mxu1 %v169_v16  ;;  %326 = vmatprep.subr.mxu0 %v588_v19 }
  0x4f   :  { %459 = vmatpush3.msra.mxu1 %v169_v16  ;;  %327 = vmatpush1.msra.mxu0 %v271_v32 }
  0x50   :  { %460 = vmatprep.subr.mxu1 %v168_v17  ;;  %328 = vmatprep.subr.mxu0 %v588_v19 }
  0x51   :  { %461 = vmatpush3.msra.mxu1 %v168_v17  ;;  %329 = vmatpush1.msra.mxu0 %v270_v33 }
  0x52   :  { %330 = vmatprep.subr.mxu0 %v588_v19 }
  0x53   :  { %331 = vmatpush1.msra.mxu0 %v269_v34 }
  0x54   :  { %332 = vmatprep.subr.mxu0 %v588_v19 }
  0x55   :  { %333 = vmatpush1.msra.mxu0 %v268_v35 }
  0x56   :  { %334 = vmatprep.subr.mxu0 %v588_v19 }
  0x57   :  { %335 = vmatpush1.msra.mxu0 %v267_v36 }
  0x58   :  { %352 = vmatprep.subr.mxu0 %v588_v19 }
  0x59   :  { %353 = vmatpush2.msra.mxu0 %v290_v37 }
  0x5a   :  { %354 = vmatprep.subr.mxu0 %v588_v19 }
  0x5b   :  { %355 = vmatpush2.msra.mxu0 %v289_v38 }
  0x5c   :  { %356 = vmatprep.subr.mxu0 %v588_v19 }
  0x5d   :  { %357 = vmatpush2.msra.mxu0 %v288_v39 }
  0x5e   :  { %358 = vmatprep.subr.mxu0 %v588_v19 }
  0x5f   :  { %359 = vmatpush2.msra.mxu0 %v287_v40 }
  0x60   :  { %360 = vmatprep.subr.mxu0 %v588_v19 }
  0x61   :  { %361 = vmatpush2.msra.mxu0 %v286_v41 }
  0x62   :  { %362 = vmatprep.subr.mxu0 %v588_v19 }
  0x63   :  { %363 = vmatpush2.msra.mxu0 %v285_v42 }
  0x64   :  { %364 = vmatprep.subr.mxu0 %v588_v19 }
  0x65   :  { %365 = vmatpush2.msra.mxu0 %v284_v43 }
  0x66   :  { %366 = vmatprep.subr.mxu0 %v588_v19 }
  0x67   :  { %367 = vmatpush2.msra.mxu0 %v283_v44 }
 0x102   :  { %v445_v23 = vpop.f32.mrf.mxu1 }
 0x104   :  { %v159_v25 = vpop.f32.mrf.mxu1 }
 0x105   :  { %259 = vrot.lane.b32.xlu0 %v159_v25, %s589_s2  ;;  %462 = vmatprep.mubr.msk.f32.mxu1 %vm86_vm0, %v159_v25 }
 0x106   :  { %463 = vmatmul.mubr.msk.f32.vlgmr.msra.gmra.mxu1 %vm86_vm0, %v445_v23 }
 0x109   :  { %261 = vrot.lane.b32.xlu0 %v445_v23, %s589_s2 }
 0x177   :  { %v260_v45 = vpop.permute.xlu0 %259 }
 0x178   :  { %v265_v50 = vsel %vm86_vm0, %v645_v3, %v260_v45 }
 0x17b   :  { %v262_v51 = vpop.permute.xlu0 %261 }
 0x17c   :  { %v266_v52 = vsel %vm86_vm0, %v649_v9, %v262_v51 }
 0x1c6   :  { %v464_v46 = vpop.f32.mrf.mxu1 }
 0x1c7   :  { %v258_v49 = vsub.f32 %v464_v46, %v649_v9 }
 0x1c8   :  { %v248_v47 = vpop.f32.mrf.mxu1 }
 0x1c9   :  { %v257_v48 = vsub.f32 %v248_v47, %v645_v3 }
 0x1cb   :  { %405 = vmatprep.mubr.msk.f32.mxu0 %vm86_vm0, %v257_v48 }
 0x1cc   :  { %369 = vmatmul.mubr.f32.vlgmr.msra.gmra.mxu0 %v265_v50 }
 0x1cd   :  { %406 = vmatprep.mubr.msk.f32.mxu0 %vm86_vm0, %v258_v49 }
 0x1d0   :  { %374 = vmatmul.mubr.f32.gmra.mxu0 %v266_v52 }
 0x28c   :  { %v370_v54 = vpop.f32.mrf.mxu0 }
 0x28d   :  { %v371_v55 = vadd.f32 %v404_v53, %v370_v54 }
 0x28e   :  { %v372_v56 = vpop.f32.mrf.mxu0 }
 0x28f   :  { %379 = vst [vmem:[#allocation10] sm:$0xff] %v371_v55 }
 0x290   :  { %v375_v57 = vpop.f32.mrf.mxu0 }
 0x291   :  { %v376_v58 = vadd.f32 %v404_v53, %v375_v57 }
 0x292   :  { %v377_v59 = vpop.f32.mrf.mxu0 }
 0x293   :  { %380 = vst [vmem:[#allocation10 + $0x8] sm:$0xff] %v376_v58 }
 0x294   :  { %565 = shalt.err (!%p562_p10)
}
 0x295   :  { %392 = dma.vmem_to_hbm [thread:$0]  %s387_s15, 256, %s701_s5, [#allocation4], %s584_s23, %s584_s23, %s585_s24  }
 0x296   :  { %580 = dma.done.wait [#allocation4], 256  }
 0x297   :  { %581 = vsyncadd [#allocation4], 4294967040 }
 0x298   :  { %396 = vsyncpa [#allocation3], 1 }
 0x299   :  { %397 = vsyncpa [#allocation6], 1 }
 0x29a   :  { %398 = vsyncpa [#allocation9], 1 }
 0x29b   :  { %399 = vsyncpa [#allocation4], 1 }

</bundles_post_ra>
